<compile_context>
chip_gen: v6e
topology: v6e:2x2x1
jax: 0.10.0
libtpu: 0.0.40
codegen_flags: <defaults>
</compile_context>

<pallas_src>
import jax
import jax.numpy as jnp
from jax.experimental import pallas as pl
from jax.experimental.pallas import tpu as pltpu


# ----------------------------- cache building -----------------------------

def build_rope_cache(theta: float, d_k: int, max_seq_len: int):
    """Mirror of RotaryPositionalEmbedding._build_cache (float32)."""
    seq_ids = jnp.arange(max_seq_len, dtype=jnp.float32)                          # (L,)
    inv_freq = 1.0 / (theta ** (jnp.arange(0, d_k, 2, dtype=jnp.float32) / d_k))  # (d_k/2,)
    freqs = jnp.outer(seq_ids, inv_freq)                                          # (L, d_k/2)
    return jnp.cos(freqs), jnp.sin(freqs)


# ------------------------------- the kernel -------------------------------

def _rope_kernel(x_ref, c_ref, sa_ref, sb_ref, o_ref):
    # x/o block: (Bb, Tr, L).  Coefficient blocks: (Tr, L) float32, shared
    # across the block's batch extent and (because their block index does not
    # depend on the inner batch grid axis) not re-DMA'd per batch step.
    lanes = x_ref.shape[-1]
    c = c_ref[...]
    sa = sa_ref[...]
    sb = sb_ref[...]
    for b in range(x_ref.shape[0]):          # static, small batch extent
        x = x_ref[b].astype(jnp.float32)                       # (Tr, L)
        # Pair-neighbor shifts on the lane axis via the XLU rotate.  The row
        # wrap-around only lands on lanes of the opposite parity, where the
        # corresponding coefficient is exactly zero, so edges stay correct.
        x_next = pltpu.roll(x, lanes - 1, axis=1)              # x[j + 1]
        x_prev = pltpu.roll(x, 1, axis=1)                      # x[j - 1]
        o_ref[b] = (x * c + x_next * sa + x_prev * sb).astype(o_ref.dtype)


# ----------------------------- tiling helpers ------------------------------

def _pick_lane_width(S: int, D: int) -> int:
    """Largest multiple-of-128 divisor of S*D (lane-dense view); fallback D.

    Any even L dividing S*D is a correct flatten width (pairs stay intact);
    a multiple of 128 makes every store an unmasked full-lane vst.
    """
    total = S * D
    for lane in (1024, 512, 256, 128):
        if total % lane == 0:
            return lane
    return D


def _pick_tiles(B: int, R: int, L: int, x_itemsize: int):
    """Choose (batch_block, row_block) for the (B, R, L) view.

    Targets ~2 MiB of x per grid step (the ~85%-of-roofline regime) while
    capping any single block at ~3 MiB so the double-buffered footprint stays
    well under v7x's 64 MiB physical VMEM.  Row blocks are multiples of 8
    unless they cover all of R.
    """
    target = 2 << 20
    cap = 3 << 20
    max_batch_block = 32                    # bounds the static in-kernel unroll
    row_bytes = L * max(x_itemsize, 4)      # coefficient streams are f32
    rows = max(8, (target // row_bytes) // 8 * 8)
    if rows < R:
        return 1, rows                      # >=2 row tiles -> megacore on rows
    # Whole per-batch slab fits one block: widen over batch to amortize the
    # per-grid-step overhead, but keep >=2 blocks when possible so a megacore
    # axis exists on v7x.
    bb = max(1, min(B, cap // max(1, R * row_bytes), max_batch_block))
    if bb >= B and B > 1:
        bb = (B + 1) // 2
    return bb, R


# -------------------------------- wrapper ----------------------------------

def rope_forward(x, token_positions, cos_cache, sin_cache):
    """Pallas-backed RotaryPositionalEmbedding.forward.

    x: (..., S, D) float32 or bfloat16; token_positions: (S,) int32 shared
    across all leading (batch/head) dims; caches: (max_seq_len, D//2) float32.
    """
    *lead, S, D = x.shape
    Dh = cos_cache.shape[-1]
    assert D % 2 == 0 and D == 2 * Dh, "x last dim must equal d_k (even)"
    # TODO(synk): per-batch (B, S) token_positions would need batch-indexed
    # coefficient streams; only a shared (S,) position vector is supported.
    assert token_positions.ndim == 1 and token_positions.shape[0] == S

    B = 1
    for d in lead:
        B *= int(d)
    x3 = x.reshape(B, S, D)

    # Tiny per-position glue in plain JAX (negligible next to (B, S, D) x):
    # gather cos/sin at the requested positions, expand to width D, and fold
    # lane parity + sign into the coefficients so the kernel needs no select:
    #   out[j] = x[j]*c[j] + x[j+1]*sa[j] + x[j-1]*sb[j]
    #   c  = [ c0, c0,  c1, c1, ...]
    #   sa = [-s0,  0, -s1,  0, ...]   (even lanes only, pairs with x[j+1])
    #   sb = [  0, s0,   0, s1, ...]   (odd  lanes only, pairs with x[j-1])
    cos_g = cos_cache[token_positions].astype(jnp.float32)       # (S, Dh)
    sin_g = sin_cache[token_positions].astype(jnp.float32)       # (S, Dh)
    c_full = jnp.repeat(cos_g, 2, axis=-1)                       # (S, D)
    s_full = jnp.repeat(sin_g, 2, axis=-1)                       # (S, D)
    even = (jnp.arange(D, dtype=jnp.int32) % 2) == 0             # (D,)
    sa = jnp.where(even, -s_full, 0.0)
    sb = jnp.where(even, 0.0, s_full)

    # Lane-dense view: (B, S, D) -> (B, R, L) with L a multiple of 128 when
    # possible, so small head dims (32/64) avoid masked partial stores.
    L = _pick_lane_width(S, D)
    R = (S * D) // L
    xf = x3.reshape(B, R, L)
    cf = c_full.reshape(R, L)
    saf = sa.reshape(R, L)
    sbf = sb.reshape(R, L)

    bb, tr = _pick_tiles(B, R, L, x.dtype.itemsize)
    n_r = pl.cdiv(R, tr)            # ragged last row-tile handled by Pallas
    n_b = pl.cdiv(B, bb)            # ragged last batch-tile handled by Pallas

    # Row axis feeds the v7x megacore when it has >=2 tiles; otherwise fall
    # back to sharding batch.  Batch stays the innermost grid axis so the
    # coefficient blocks (index independent of bi) are reused, not re-fetched.
    dim_sem = ("parallel", "arbitrary") if n_r > 1 else ("arbitrary", "parallel")

    itemsize = x.dtype.itemsize
    blk_x = bb * tr * L * itemsize
    blk_c = tr * L * 4
    resident = 2 * (2 * blk_x + 3 * blk_c)          # double-buffered streams
    vmem_limit = int(min(64 << 20, max(32 << 20, resident + (8 << 20))))

    cost = pl.CostEstimate(
        flops=6 * B * S * D,
        transcendentals=0,
        bytes_accessed=2 * B * S * D * itemsize + 3 * S * D * 4,
    )

    out = pl.pallas_call(
        _rope_kernel,
        out_shape=jax.ShapeDtypeStruct((B, R, L), x.dtype),
        grid=(n_r, n_b),
        in_specs=[
            pl.BlockSpec((bb, tr, L), lambda ri, bi: (bi, ri, 0)),   # x
            pl.BlockSpec((tr, L), lambda ri, bi: (ri, 0)),           # cos
            pl.BlockSpec((tr, L), lambda ri, bi: (ri, 0)),           # sin (even)
            pl.BlockSpec((tr, L), lambda ri, bi: (ri, 0)),           # sin (odd)
        ],
        out_specs=pl.BlockSpec((bb, tr, L), lambda ri, bi: (bi, ri, 0)),
        compiler_params=pltpu.CompilerParams(
            dimension_semantics=dim_sem,
            vmem_limit_bytes=vmem_limit,
        ),
        cost_estimate=cost,
    )(xf, cf, saf, sbf)
    return out.reshape(x.shape)


# ------------------------------ reference ---------------------------------

def rope_reference(x, token_positions, cos_cache, sin_cache):
    cos = cos_cache[token_positions]              # (S, Dh)
    sin = sin_cache[token_positions]
    x_even = x[..., 0::2].astype(jnp.float32)
    x_odd = x[..., 1::2].astype(jnp.float32)
    out1 = x_even * cos - x_odd * sin
    out2 = x_even * sin + x_odd * cos
    return jnp.stack((out1, out2), axis=-1).reshape(x.shape)


# --------------------------------- main ------------------------------------

if __name__ == "__main__":
    THETA = 10000.0

    def run_case(shape, max_seq_len, dtype, tol):
        d_k, S = shape[-1], shape[-2]
        kx, kp = jax.random.split(jax.random.PRNGKey(0))
        x = jax.random.normal(kx, shape, dtype=jnp.float32).astype(dtype)
        pos = jax.random.randint(kp, (S,), 0, max_seq_len, dtype=jnp.int32)
        cos_c, sin_c = build_rope_cache(THETA, d_k, max_seq_len)
        out = jax.block_until_ready(rope_forward(x, pos, cos_c, sin_c))
        ref = rope_reference(x, pos, cos_c, sin_c)
        assert out.shape == x.shape and out.dtype == x.dtype
        assert jnp.allclose(out.astype(jnp.float32), ref, atol=tol, rtol=tol), shape

    # Canonical small case (matches the PyTorch module's typical usage).
    run_case((2, 8, 32), 64, jnp.float32, 1e-5)
    # Batch-widened blocks + ragged batch grid.
    run_case((3, 48, 64), 128, jnp.float32, 1e-5)
    # Extra leading (batch, head) dims.
    run_case((2, 4, 16, 64), 64, jnp.float32, 1e-5)
    # bf16 activations (coefficients stay f32; math done in f32 in-register).
    run_case((2, 8, 32), 64, jnp.bfloat16, 3e-2)

    print("KERNEL_OK")
</pallas_src>

<mosaic_0001>
module attributes {stable_mosaic.version = 11 : i64} {
  func.func @_rope_kernel(%arg0: i32, %arg1: i32, %arg2: memref<1x1x256xf32, #tpu.memory_space<vmem>>, %arg3: memref<1x256xf32, #tpu.memory_space<vmem>>, %arg4: memref<1x256xf32, #tpu.memory_space<vmem>>, %arg5: memref<1x256xf32, #tpu.memory_space<vmem>>, %arg6: memref<1x1x256xf32, #tpu.memory_space<vmem>>) attributes {dimension_semantics = [#tpu.dimension_semantics<arbitrary>, #tpu.dimension_semantics<parallel>], iteration_bounds = array<i64: 1, 2>, scalar_prefetch = 0 : i64, scratch_operands = 0 : i64, tpu.core_type = #tpu.core_type<tc>, window_params = [{transform_indices = @transform_0, window_bounds = array<i64: 1, 1, 256>}, {transform_indices = @transform_1, window_bounds = array<i64: 1, 256>}, {transform_indices = @transform_2, window_bounds = array<i64: 1, 256>}, {transform_indices = @transform_3, window_bounds = array<i64: 1, 256>}, {transform_indices = @transform_4, window_bounds = array<i64: 1, 1, 256>}]} {
    %c0 = arith.constant 0 : index
    %c0_0 = arith.constant 0 : index
    %0 = vector.load %arg3[%c0, %c0_0] : memref<1x256xf32, #tpu.memory_space<vmem>>, vector<1x256xf32>
    %c0_1 = arith.constant 0 : index
    %c0_2 = arith.constant 0 : index
    %1 = vector.load %arg4[%c0_1, %c0_2] : memref<1x256xf32, #tpu.memory_space<vmem>>, vector<1x256xf32>
    %c0_3 = arith.constant 0 : index
    %c0_4 = arith.constant 0 : index
    %2 = vector.load %arg5[%c0_3, %c0_4] : memref<1x256xf32, #tpu.memory_space<vmem>>, vector<1x256xf32>
    %c0_5 = arith.constant 0 : index
    %c0_6 = arith.constant 0 : index
    %c0_7 = arith.constant 0 : index
    %3 = vector.load %arg2[%c0_5, %c0_6, %c0_7] : memref<1x1x256xf32, #tpu.memory_space<vmem>>, vector<1x1x256xf32>
    %4 = vector.shape_cast %3 : vector<1x1x256xf32> to vector<1x256xf32>
    %c255_i32 = arith.constant 255 : i32
    %5 = tpu.dynamic_rotate %4 by %c255_i32 dim 1 : vector<1x256xf32>, i32 -> vector<1x256xf32>
    %c1_i32 = arith.constant 1 : i32
    %6 = tpu.dynamic_rotate %4 by %c1_i32 dim 1 : vector<1x256xf32>, i32 -> vector<1x256xf32>
    %7 = arith.mulf %4, %0 : vector<1x256xf32>
    %8 = arith.mulf %5, %1 : vector<1x256xf32>
    %9 = arith.addf %7, %8 : vector<1x256xf32>
    %10 = arith.mulf %6, %2 : vector<1x256xf32>
    %11 = arith.addf %9, %10 : vector<1x256xf32>
    %c0_8 = arith.constant 0 : index
    %c0_9 = arith.constant 0 : index
    %c0_10 = arith.constant 0 : index
    %12 = vector.load %arg6[%c0_8, %c0_9, %c0_10] : memref<1x1x256xf32, #tpu.memory_space<vmem>>, vector<1x1x256xf32>
    %13 = vector.shape_cast %12 : vector<1x1x256xf32> to vector<1x256xf32>
    %14 = vector.shape_cast %11 : vector<1x256xf32> to vector<1x1x256xf32>
    tpu.vector_store %arg6[%c0_8, %c0_9, %c0_10], %14 {strides = array<i32>} : memref<1x1x256xf32, #tpu.memory_space<vmem>>, vector<1x1x256xf32>,
    return
  }
  func.func @transform_0(%arg0: i32, %arg1: i32) -> (i32, i32, i32) {
    %c0_i32 = arith.constant 0 : i32
    %c0_i32_0 = arith.constant 0 : i32
    return %arg1, %arg0, %c0_i32 : i32, i32, i32
  }
  func.func @transform_1(%arg0: i32, %arg1: i32) -> (i32, i32) {
    %c0_i32 = arith.constant 0 : i32
    %c0_i32_0 = arith.constant 0 : i32
    return %arg0, %c0_i32 : i32, i32
  }
  func.func @transform_2(%arg0: i32, %arg1: i32) -> (i32, i32) {
    %c0_i32 = arith.constant 0 : i32
    %c0_i32_0 = arith.constant 0 : i32
    return %arg0, %c0_i32 : i32, i32
  }
  func.func @transform_3(%arg0: i32, %arg1: i32) -> (i32, i32) {
    %c0_i32 = arith.constant 0 : i32
    %c0_i32_0 = arith.constant 0 : i32
    return %arg0, %c0_i32 : i32, i32
  }
  func.func @transform_4(%arg0: i32, %arg1: i32) -> (i32, i32, i32) {
    %c0_i32 = arith.constant 0 : i32
    %c0_i32_0 = arith.constant 0 : i32
    return %arg1, %arg0, %c0_i32 : i32, i32, i32
  }
}

</mosaic_0001>

<bundles_post_ra>
// kernel: tpu_custom_call.1
= control target key start
LH: loop header
LB: loop body
LE: loop exit
PB: predicated region body
PF: predicated region fallthrough
CT: control target
= control target key end

     0   :  { %9 = vsyncpa [#allocation3], 0  ;;  %s970_s0 = inlined_call_operand.hbm [shape: f32[2,1,256], index: 0, kind: input, shape index: {}]   ;;  %s971_s1 = inlined_call_operand.hbm [shape: f32[1,256], index: 1, kind: input, shape index: {}]   ;;  %s972_s2 = inlined_call_operand.vmem [shape: f32[1,256], index: 2, kind: input, shape index: {}]   ;;  %s973_s3 = inlined_call_operand.vmem [shape: f32[1,256], index: 3, kind: input, shape index: {}]   ;;  %s974_s4 = inlined_call_operand.hbm [shape: f32[2,1,256], index: 4, kind: output, shape index: {}]  }
   0x1   :  { %11 = vsyncpa [#allocation3 + $0x1], 0 }
   0x2   :  { %12 = vsyncpa [#allocation6], 0 }
   0x3   :  { %13 = vsyncpa [#allocation4], 0 }
   0x4   :  { %15 = vsyncpa [#allocation4 + $0x1], 0  ;;  %s799_s15 = smov 0   ;;  %s801_s16 = smov 0  }
   0x5   :  { %s803_s17 = smov 0   ;;  %s805_s18 = smov 0  }
   0x6   :  { %s807_s19 = smov 0   ;;  %s809_s20 = smov 0  }
   0x7 LB: > { %s531_s21 = sadd.s32 4294967295, %s766_s20   ;;  %s532_s22 = sadd.s32 4294967294, %s766_s20   ;;  %s766_s20 = sphi %s809_s20, %s21_s20   ;;  %s762_s19 = sphi %s807_s19, %s991_s19   ;;  %s758_s18 = sphi %s805_s18, %s990_s18   ;;  %s754_s17 = sphi %s803_s17, %s989_s17   ;;  %s750_s16 = sphi %s801_s16, %s988_s16   ;;  %s746_s15 = sphi %s799_s15, %s987_s15  }
   0x8   : > { %p55_p0 = scmp.ne.s32.totalorder %s750_s16, %s746_s15  ;;  %p833_p1 = scmp.eq.s32.totalorder %s531_s21, 0 }
   0x9   : > { %p837_p2 = scmp.eq.s32.totalorder %s531_s21, 1  ;;  %p165_p3 = scmp.eq.s32.totalorder %s532_s22, 1 }
   0xa   : > { %p843_p4 = por %p833_p1, %p55_p0  ;;  %p533_p5 = scmp.ge.s32.totalorder %s766_s20, 1 }
   0xb   : > { %p848_p6 = por %p165_p3, %p55_p0  ;;  %p172_p7 = scmp.lt.s32.totalorder %s766_s20, 3 }
   0xc   : > { %s978_s25 = scalar_select %p843_p4, 1, 0 }
   0xd   : > { %s979_s26 = scalar_select %p848_p6, 1, 0 }
   0xe   : > { %p853_p8 = pnand %p533_p5, %p172_p7  ;;  %s768_s28 = smov [#allocation5]  }
   0xf   : > { %s188_s29 = sshll.u32 %s768_s28, 4  ;;  %s30_s5 = sadd.s32 1, %s762_s19  ;;  %s189_s29 = int_to_ptr.vmem [resolvable:$true] %s188_s29 }
  0x10   : > { %p560_p10 = pneg %p853_p8  ;;  %s42_s6 = sadd.s32 1, %s754_s17 }
  0x11   : > { %p31_p12 = scmp.ge.s32.totalorder %s30_s5, 2  ;;  %s639_s7 = scalar_lea.vmem %s189_s29, 32 }
  0x12   : > { %p862_p11 = pnand %p560_p10, %p833_p1  ;;  %p640_p0 = scmp.ne.s32.totalorder %s189_s29, %s639_s7 }
  0x13   : > { %p647_p7 = scmp.lt.s32.totalorder %s189_s29, %s189_s29  ;;  %p648_p6 = scmp.lt.s32.totalorder %s639_s7, %s639_s7 }
  0x14   : > { %p630_p13 = pneg %p862_p11 }
  0x15   : > { %p649_p9 = por %p648_p6, %p647_p7 }
  0x16   : > { %p642_p3 = pnand %p640_p0, %p630_p13 }
  0x18   : > { %p643_p5 = pneg %p642_p3 }
  0x1a   : > { %p650_p4 = pnand %p649_p9, %p643_p5 }
  0x1c   : > { %653 = shalt.err (!%p650_p4)
}
  0x1d   : > { %563 = dma.hbm_to_vmem [thread:$0]  (!%p862_p11), %s971_s1, 32, %s189_s29, [#allocation6]  }
  0x1e   : > { %s993_s5 = smov (%p31_p12, %s30_s5), 0  ;;  %p49_p6 = scmp.ne.s32.totalorder %s754_s17, %s750_s16 }
  0x1f   : > { %p50_p4 = scmp.eq.s32.totalorder %s766_s20, 0  ;;  %s37_s10 = ssub.s32 %s762_s19, %s993_s5 }
  0x20   : > { %p573_p9 = scmp.lt.s32.totalorder %s766_s20, 2  ;;  %p40_p10 = scmp.eq.s32.totalorder %s37_s10, 0 }
  0x21   : > { %p51_p13 = por %p50_p4, %p49_p6  ;;  %p885_p0 = por %p837_p2, %p49_p6 }
  0x22   : > { %s213_s12 = sand.u32 1, %s754_s17   ;;  %s550_s21 = sshll.u32 %s762_s19, 5 }
  0x23   : > { %s891_s13 = scalar_select %p40_p10, %s754_s17, %s42_s6  }
  0x24   : > { %s538_s14 = sshll.u32 %s213_s12, 1  ;;  %s225_s29 = scalar_lea.hbm %s970_s0, %s550_s21 }
  0x25   : > { %s217_s30 = scalar_lea.vmem [#allocation2], %s538_s14  ;;  %p897_p11 = pnand %p573_p9, %p51_p13 }
  0x26   : > { %s227_s7 = sshll.u32 %s217_s30, 4  ;;  %s214_s24 = scalar_lea.sflag [#allocation3], %s213_s12  ;;  %s228_s7 = int_to_ptr.vmem [resolvable:$true] %s227_s7 }
  0x27   : > { %p656_p2 = pneg %p897_p11  ;;  %s667_s9 = scalar_lea.vmem %s228_s7, 32 }
  0x28   : > { %p668_p12 = scmp.ne.s32.totalorder %s228_s7, %s667_s9  ;;  %s769_s6 = smov [#allocation2]  }
  0x29   : > { %s672_s10 = sshll.u32 %s769_s6, 4  ;;  %s673_s10 = int_to_ptr.vmem [resolvable:$false] %s672_s10 }
  0x2a   : > { %p670_p3 = pnand %p668_p12, %p656_p2  ;;  %s674_s22 = scalar_lea.vmem %s673_s10, 64 }
  0x2b   : > { %p675_p7 = scmp.lt.s32.totalorder %s228_s7, %s673_s10  ;;  %p676_p6 = scmp.lt.s32.totalorder %s674_s22, %s667_s9 }
  0x2c   : > { %p671_p5 = pneg %p670_p3 }
  0x2d   : > { %p677_p4 = por %p676_p6, %p675_p7 }
  0x2f   : > { %p678_p10 = pnand %p677_p4, %p671_p5 }
  0x31   : > { %681 = shalt.err (!%p678_p10)
}
  0x32   : > { %567 = dma.hbm_to_vmem [thread:$0]  (!%p897_p11), %s225_s29, 32, %s228_s7, %s214_s24  }
  0x33   : > { %236 = sbr.rel (%p853_p8) target bundleno = 212 (0xd4), region = 36  ;;  %s908_s12 = sand.u32 (!%p853_p8), 1, %s750_s16  }
  0x34   : > { %s542_s14 = sshll.u32 (!%p853_p8), %s908_s12, 1  ;;  %s239_s21 = scalar_lea.sflag (!%p853_p8), [#allocation3], %s908_s12 }
  0x35   : > { %s242_s28 = scalar_lea.vmem (!%p853_p8), [#allocation2], %s542_s14  ;;  %p984_p9 = scmp.ne.s32.totalorder (!%p853_p8), %s978_s25, 0 }
  0x38   : > { %733 = dma.done.wait (%p984_p9), %s239_s21, 32  }
  0x39   : > { %735 = vsyncadd (%p984_p9), %s239_s21, 4294967264 }
  0x3a   : > { %737 = dma.done.wait (%p833_p1), [#allocation6], 32  }
  0x3b   : > { %739 = vsyncadd (%p833_p1), [#allocation6], 4294967264  ;;  %v292_v0 = vlaneseq  ;;  %v290_v4 = vld [vmem:[%s242_s28] sm:$0x3]  ;;  %s770_s27 = smov 1   ;;  %s771_s29 = smov 127  }
  0x3c   : > { %v772_v7 = vmov 1966171168   ;;  %v289_v10 = vld [vmem:[%s973_s3] sm:$0x3]  ;;  %v287_v30 = vld [vmem:[#allocation5] sm:$0x3] }
  0x3d   : > { %v293_v1 = vshrl.u32 %v292_v0, 7  ;;  %v336_v8 = vunpack.c.l.s4 %v772_v7  ;;  %v307_v9 = vand.u32 127, %v292_v0  ;;  %v288_v11 = vld [vmem:[%s972_s2] sm:$0x3]  ;;  %v318_v33 = vmul.f32 %v290_v4, %v287_v30  ;;  %s551_s8 = sshll.u32 %s758_s18, 5  ;;  %s278_s24 = scalar_lea.vmem [#allocation7], %s542_s14 }
  0x3e   : > { %s405_s9 = sshll.u32 %s278_s24, 4  ;;  %vm385_vm2 = vcmp.lt.s32.totalorder %v292_v0, 256  ;;  %s403_s22 = scalar_lea.hbm %s974_s4, %s551_s8  ;;  %s406_s9 = int_to_ptr.vmem [resolvable:$true] %s405_s9 }
  0x3f   : > { %v294_v2 = vsub.s32 0, %v293_v1  ;;  %v298_v3 = vsub.s32 1, %v293_v1  ;;  %v337_v14 = vunpack.c.0.s8 %v336_v8  ;;  %vm315_vm0 = vcmp.lt.s32.totalorder %v307_v9, 1  ;;  %s389_s21 = scalar_lea.sflag [#allocation4], %s908_s12  ;;  %s682_s28 = scalar_lea.vmem %s406_s9, 32 }
  0x40   : > { %vm308_vm1 = vcmp.lt.s32.totalorder %v307_v9, 127  ;;  %p683_p1 = scmp.ne.s32.totalorder %s406_s9, %s682_s28 }
  0x41   : > { %v295_v5 = vrot.slane %v290_v4, %v294_v2  ;;  %v299_v6 = vrot.slane %v290_v4, %v298_v3  ;;  %v355_v15 = vrot.slane %v289_v10, %v294_v2  ;;  %v359_v16 = vrot.slane %v289_v10, %v298_v3 }
  0x42   : > { %v323_v17 = vrot.slane %v288_v11, %v294_v2  ;;  %v327_v18 = vrot.slane %v288_v11, %v298_v3  ;;  %v340_v19 = vsub.s32 %v337_v14, %v293_v1  ;;  %p684_p8 = pnand %p683_p1, %p885_p0 }
  0x43   : > { %311 = vrot.lane.b32.xlu1 %v295_v5, %s770_s27  ;;  %302 = vrot.lane.b32.xlu0 %v295_v5, %s771_s29 }
  0x44   : > { %p685_p13 = pneg %p684_p8 }
  0x47   : > { %313 = vrot.lane.b32.xlu1 %v299_v6, %s770_s27  ;;  %304 = vrot.lane.b32.xlu0 %v299_v6, %s771_s29  ;;  %s773_s27 = smov [#allocation7]  }
  0x48   : > { %s686_s18 = sshll.u32 %s773_s27, 4  ;;  %s687_s18 = int_to_ptr.vmem [resolvable:$false] %s686_s18 }
  0x49   : > { %s688_s14 = scalar_lea.vmem %s687_s18, 64  ;;  %p689_p11 = scmp.lt.s32.totalorder %s406_s9, %s687_s18 }
  0x4a   : > { %p690_p2 = scmp.lt.s32.totalorder %s688_s14, %s682_s28 }
  0x4c   : > { %p691_p12 = por %p690_p2, %p689_p11 }
  0x4e   : > { %p692_p3 = pnand %p691_p12, %p685_p13 }
  0xb5   : > { %v312_v12 = vpop.permute.xlu1 %311  ;;  %v303_v13 = vpop.permute.xlu0 %302 }
  0xb9   : > { %v314_v20 = vpop.permute.xlu1 %313  ;;  %v305_v21 = vpop.permute.xlu0 %304 }
  0xba   : > { %v316_v22 = vsel %vm315_vm0, %v312_v12, %v314_v20  ;;  %v317_v23 = vsel %vm315_vm0, %v314_v20, %v312_v12  ;;  %v309_v24 = vsel %vm308_vm1, %v303_v13, %v305_v21  ;;  %v310_v25 = vsel %vm308_vm1, %v305_v21, %v303_v13 }
  0xbb   : > { %v362_v26 = vmul.f32 %v355_v15, %v317_v23  ;;  %v363_v27 = vmul.f32 %v359_v16, %v316_v22  ;;  %v330_v28 = vmul.f32 %v323_v17, %v309_v24  ;;  %v331_v29 = vmul.f32 %v327_v18, %v310_v25 }
  0xbd   : > { %v366_v31 = vcombine.low %v362_v26, %v363_v27  ;;  %v334_v32 = vcombine.low %v330_v28, %v331_v29 }
  0xbf   : > { %v373_v34 = vrot.slane %v366_v31, %v340_v19  ;;  %v341_v35 = vrot.slane %v334_v32, %v340_v19 }
  0xc1   : > { %v380_v36 = vrot.slane %v373_v34, %v340_v19  ;;  %v348_v37 = vrot.slane %v341_v35, %v340_v19 }
  0xc3   : > { %v350_v38 = vadd.f32 %v348_v37, %v318_v33 }
  0xc5   : > { %v382_v39 = vadd.f32 %v380_v36, %v350_v38 }
  0xc7   : > { %387 = vst.msk [vmem:[%s278_s24] sm:$0x3] %vm385_vm2, %v382_v39 }
  0xc8   : > { %695 = shalt.err (!%p692_p3)
}
  0xc9   : > { %s696_s29 = scalar_lea.hbm %s403_s22, 32  ;;  %s700_s30 = scalar_lea.hbm %s974_s4, 64 }
  0xca   : > { %p697_p5 = scmp.ne.s32.totalorder %s403_s22, %s696_s29  ;;  %p701_p4 = scmp.lt.s32.totalorder %s403_s22, %s974_s4 }
  0xcb   : > { %p702_p10 = scmp.lt.s32.totalorder %s700_s30, %s696_s29 }
  0xcc   : > { %p698_p7 = pnand %p697_p5, %p885_p0 }
  0xcd   : > { %p703_p9 = por %p702_p10, %p701_p4 }
  0xce   : > { %p699_p6 = pneg %p698_p7 }
  0xd0   : > { %p704_p1 = pnand %p703_p9, %p699_p6 }
  0xd2   : > { %707 = shalt.err (!%p704_p1)
}
  0xd3   : > { %558 = dma.vmem_to_hbm [thread:$0]  (%p885_p0), %s406_s9, 32, %s403_s22, %s389_s21  }
  0xd4 PF: > { %s417_s8 = sand.u32 1, %s746_s15   ;;  %p985_p8 = scmp.ne.s32.totalorder %s979_s26, 0 }
  0xd5   : > { %p986_p13 = scmp.ge.s32.totalorder %s766_s20, 2  ;;  %s418_s24 = scalar_lea.sflag [#allocation4], %s417_s8 }
  0xd7   : > { %p569_p11 = pnand %p986_p13, %p985_p8 }
  0xd9   : > { %p570_p2 = pneg %p569_p11 }
  0xdb   : > { %741 = dma.done.wait (%p570_p2), %s418_s24, 32  }
  0xdc   : > { %743 = vsyncadd (%p570_p2), %s418_s24, 4294967264  ;;  %s21_s20 = sadd.s32 1, %s766_s20   ;;  %s987_s15 = smov %s750_s16 }
  0xdd   : > { %p18_p12 = scmp.ge.s32.totalorder %s21_s20, 4   ;;  %s988_s16 = smov %s754_s17 }
  0xde   : > { %s989_s17 = smov %s891_s13  ;;  %s990_s18 = smov %s762_s19 }
  0xdf   : > { %s991_s19 = smov %s993_s5  ;;  %20 = sbr.rel (!%p18_p12) target bundleno = 7 (0x7), region = 92 }
  0xe4   :  { %423 = vsyncpa [#allocation3], 1 }
  0xe5   :  { %425 = vsyncpa [#allocation3 + $0x1], 1 }
  0xe6   :  { %426 = vsyncpa [#allocation6], 1 }
  0xe7   :  { %427 = vsyncpa [#allocation4], 1 }
  0xe8   :  { %429 = vsyncpa [#allocation4 + $0x1], 1 }

</bundles_post_ra>
